<compile_context>
chip_gen: v6e
topology: v6e:2x2x1
jax: 0.10.0
libtpu: 0.0.40
codegen_flags: <defaults>
</compile_context>

<pallas_src>
import jax
import jax.numpy as jnp
from jax import lax
from jax.experimental import pallas as pl
from jax.experimental.pallas import tpu as pltpu


def _attention_kernel(xq_ref, xkv_ref, wq_ref, wk_ref, wv_ref, wo_ref, bo_ref,
                      o_ref, acc_ref):
    # xq_ref:  (1, tq, D)      bf16   query rows tile
    # xkv_ref: (1, N,  D)      bf16   full sequence (for K / V of this batch)
    # wq_ref:  (1, D, Dh)      bf16   this head's Wq (softmax scale pre-folded)
    # wk_ref:  (1, D, Dh)      bf16
    # wv_ref:  (1, D, Dh)      bf16
    # wo_ref:  (1, Dh, D)      bf16   this head's slice of Wout
    # bo_ref:  (1, D)          f32    output-projection bias (added once)
    # o_ref:   (1, tq, D)             output tile (written on last head)
    # acc_ref: (tq, D)         f32    per-(batch, q-tile) accumulator over heads
    h = pl.program_id(2)
    num_heads = pl.num_programs(2)

    @pl.when(h == 0)
    def _():
        acc_ref[...] = jnp.zeros_like(acc_ref)

    xq = xq_ref[0]                     # (tq, D)  bf16
    xkv = xkv_ref[0]                   # (N,  D)  bf16
    wq = wq_ref[0]                     # (D, Dh)  bf16
    wk = wk_ref[0]
    wv = wv_ref[0]
    wo = wo_ref[0]                     # (Dh, D)  bf16
    cdt = xq.dtype                     # bf16 compute dtype for MXU operands

    # Per-head projections (bf16 operands, f32 accumulation on the MXU).
    q = jnp.dot(xq, wq, preferred_element_type=jnp.float32).astype(cdt)    # (tq, Dh)
    k = jnp.dot(xkv, wk, preferred_element_type=jnp.float32).astype(cdt)   # (N, Dh)
    v = jnp.dot(xkv, wv, preferred_element_type=jnp.float32).astype(cdt)   # (N, Dh)

    # Scores: contract the Dh dims directly (no explicit transpose of k).
    dots = lax.dot_general(q, k, (((1,), (1,)), ((), ())),
                           preferred_element_type=jnp.float32)             # (tq, N)

    # Numerically-stable softmax; reciprocal goes to the EUP slot.
    m = jnp.max(dots, axis=-1, keepdims=True)
    p = jnp.exp(dots - m)
    denom = jnp.sum(p, axis=-1, keepdims=True)
    attn = p * pl.reciprocal(denom, approx=True)                           # (tq, N) f32

    out_h = jnp.dot(attn.astype(cdt), v,
                    preferred_element_type=jnp.float32)                    # (tq, Dh) f32

    # Accumulate this head's contribution to the output projection.
    acc_ref[...] += jnp.dot(out_h.astype(cdt), wo,
                            preferred_element_type=jnp.float32)            # (tq, D)

    @pl.when(h == num_heads - 1)
    def _():
        o_ref[0] = (acc_ref[...] + bo_ref[...]).astype(o_ref.dtype)


def attention_forward(x, w_qkv, w_out, b_out=None, *, heads, dim_head,
                      q_tile=None, compute_dtype=jnp.bfloat16):
    """MAE Attention forward.

    x:     (B, N, D)
    w_qkv: (D, 3 * heads * dim_head)   (transposed PyTorch to_qkv weight)
    w_out: (heads * dim_head, D)       (transposed PyTorch to_out weight)
    b_out: (D,) or None                (to_out bias)
    """
    B, N, D = x.shape
    inner = heads * dim_head
    assert w_qkv.shape == (D, 3 * inner)
    assert w_out.shape == (inner, D)
    scale = dim_head ** (-0.5)

    # ---- wrapper-side layout plumbing (not compute) -------------------------
    # Per-head weight slabs: (heads, D, dim_head) for q/k/v, (heads, dim_head, D)
    # for the output projection.  Fold the softmax scale into Wq.
    wq, wk, wv = jnp.split(w_qkv, 3, axis=1)                     # each (D, inner)

    def per_head(w):                                             # (D, inner) -> (H, D, Dh)
        return w.reshape(D, heads, dim_head).transpose(1, 0, 2)

    wq = per_head(wq) * scale
    wk = per_head(wk)
    wv = per_head(wv)
    wo = w_out.reshape(heads, dim_head, D)

    # bf16 MXU operands; f32 accumulation inside the kernel.
    xc = x.astype(compute_dtype)
    wq = wq.astype(compute_dtype)
    wk = wk.astype(compute_dtype)
    wv = wv.astype(compute_dtype)
    wo = wo.astype(compute_dtype)

    if b_out is None:
        b_out = jnp.zeros((D,), jnp.float32)
    bo = b_out.reshape(1, D).astype(jnp.float32)

    # Query-dim tiling: (8,128)-friendly tile that divides N.
    if q_tile is None:
        q_tile = N if N <= 128 else 128
    assert N % q_tile == 0 and (q_tile % 8 == 0 or q_tile == N)
    nq = N // q_tile

    grid = (B, nq, heads)

    return pl.pallas_call(
        _attention_kernel,
        out_shape=jax.ShapeDtypeStruct((B, N, D), x.dtype),
        grid_spec=pltpu.PrefetchScalarGridSpec(
            num_scalar_prefetch=0,
            grid=grid,
            in_specs=[
                # query rows tile
                pl.BlockSpec((1, q_tile, D), lambda b, qi, h: (b, qi, 0)),
                # full sequence for K/V of this batch
                pl.BlockSpec((1, N, D), lambda b, qi, h: (b, 0, 0)),
                # one head's weights per step
                pl.BlockSpec((1, D, dim_head), lambda b, qi, h: (h, 0, 0)),
                pl.BlockSpec((1, D, dim_head), lambda b, qi, h: (h, 0, 0)),
                pl.BlockSpec((1, D, dim_head), lambda b, qi, h: (h, 0, 0)),
                pl.BlockSpec((1, dim_head, D), lambda b, qi, h: (h, 0, 0)),
                # output bias (constant across the grid)
                pl.BlockSpec((1, D), lambda b, qi, h: (0, 0)),
            ],
            out_specs=pl.BlockSpec((1, q_tile, D), lambda b, qi, h: (b, qi, 0)),
            scratch_shapes=[pltpu.VMEM((q_tile, D), jnp.float32)],
        ),
        compiler_params=pltpu.CompilerParams(
            # batch and q-tile are independent; heads is the output-accumulation axis
            dimension_semantics=("parallel", "parallel", "arbitrary"),
        ),
    )(xc, xc, wq, wk, wv, wo, bo)


def attention_reference(x, w_qkv, w_out, b_out, *, heads, dim_head):
    """Pure-JAX (f32) reference mirroring the PyTorch forward."""
    B, N, D = x.shape
    inner = heads * dim_head
    scale = dim_head ** (-0.5)

    qkv = jnp.einsum("bnd,de->bne", x, w_qkv)
    q, k, v = jnp.split(qkv, 3, axis=-1)

    def split_heads(t):  # 'b n (h d) -> b h n d'
        return t.reshape(B, N, heads, dim_head).transpose(0, 2, 1, 3)

    q, k, v = map(split_heads, (q, k, v))
    dots = jnp.einsum("bhnd,bhmd->bhnm", q, k) * scale
    attn = jax.nn.softmax(dots, axis=-1)
    out = jnp.einsum("bhnm,bhmd->bhnd", attn, v)
    out = out.transpose(0, 2, 1, 3).reshape(B, N, inner)     # 'b h n d -> b n (h d)'
    return jnp.einsum("bni,id->bnd", out, w_out) + b_out


if __name__ == "__main__":
    # Small shapes consistent with the module's forward pass.
    B, N, D = 2, 8, 32
    heads, dim_head = 4, 16
    inner = heads * dim_head

    key = jax.random.PRNGKey(0)
    kx, kqkv, kout, kb = jax.random.split(key, 4)

    x = jax.random.normal(kx, (B, N, D), dtype=jnp.float32)
    # PyTorch Linear weights are (out, in); we store the transpose (in, out)
    # so the math is y = x @ W.
    w_qkv = jax.random.normal(kqkv, (D, 3 * inner), dtype=jnp.float32) * (1.0 / D ** 0.5)
    w_out = jax.random.normal(kout, (inner, D), dtype=jnp.float32) * (1.0 / inner ** 0.5)
    b_out = jax.random.normal(kb, (D,), dtype=jnp.float32) * 0.1

    y = attention_forward(x, w_qkv, w_out, b_out, heads=heads, dim_head=dim_head)
    y = jax.block_until_ready(y)
    assert y.shape == (B, N, D), y.shape

    # Reference on bf16-rounded inputs (the kernel uses bf16 MXU operands with
    # f32 accumulation), compared with a bf16-appropriate tolerance.
    xb = x.astype(jnp.bfloat16).astype(jnp.float32)
    wqkvb = w_qkv.astype(jnp.bfloat16).astype(jnp.float32)
    woutb = w_out.astype(jnp.bfloat16).astype(jnp.float32)
    y_ref = attention_reference(xb, wqkvb, woutb, b_out, heads=heads, dim_head=dim_head)

    assert jnp.allclose(y, y_ref, atol=5e-2, rtol=5e-2), (
        "mismatch vs reference: max abs err "
        f"{float(jnp.max(jnp.abs(y - y_ref)))}"
    )

    print("KERNEL_OK")
</pallas_src>

<mosaic_0001>
module attributes {stable_mosaic.version = 11 : i64} {
  func.func @_attention_kernel(%arg0: i32, %arg1: i32, %arg2: i32, %arg3: memref<1x8x32xbf16, #tpu.memory_space<vmem>>, %arg4: memref<1x8x32xbf16, #tpu.memory_space<vmem>>, %arg5: memref<1x32x16xbf16, #tpu.memory_space<vmem>>, %arg6: memref<1x32x16xbf16, #tpu.memory_space<vmem>>, %arg7: memref<1x32x16xbf16, #tpu.memory_space<vmem>>, %arg8: memref<1x16x32xbf16, #tpu.memory_space<vmem>>, %arg9: memref<1x32xf32, #tpu.memory_space<vmem>>, %arg10: memref<1x8x32xf32, #tpu.memory_space<vmem>>, %arg11: memref<8x32xf32, #tpu.memory_space<vmem>>) attributes {dimension_semantics = [#tpu.dimension_semantics<parallel>, #tpu.dimension_semantics<parallel>, #tpu.dimension_semantics<arbitrary>], iteration_bounds = array<i64: 2, 1, 4>, scalar_prefetch = 0 : i64, scratch_operands = 1 : i64, tpu.core_type = #tpu.core_type<tc>, window_params = [{transform_indices = @transform_0, window_bounds = array<i64: 1, 8, 32>}, {transform_indices = @transform_1, window_bounds = array<i64: 1, 8, 32>}, {transform_indices = @transform_2, window_bounds = array<i64: 1, 32, 16>}, {transform_indices = @transform_3, window_bounds = array<i64: 1, 32, 16>}, {transform_indices = @transform_4, window_bounds = array<i64: 1, 32, 16>}, {transform_indices = @transform_5, window_bounds = array<i64: 1, 16, 32>}, {pipeline_mode = #tpu.pipeline_mode<synchronous>, transform_indices = @transform_6, window_bounds = array<i64: 1, 32>}, {transform_indices = @transform_7, window_bounds = array<i64: 1, 8, 32>}]} {
    %c0_i32 = arith.constant 0 : i32
    %0 = arith.cmpi eq, %arg2, %c0_i32 : i32
    %1 = arith.extui %0 : i1 to i32
    %c0_i32_0 = arith.constant 0 : i32
    %2 = arith.cmpi ne, %1, %c0_i32_0 : i32
    scf.if %2 {
      %cst_30 = arith.constant 0.000000e+00 : f32
      %42 = vector.broadcast %cst_30 : f32 to vector<8x32xf32>
      %c0_31 = arith.constant 0 : index
      %c0_32 = arith.constant 0 : index
      %43 = vector.load %arg11[%c0_31, %c0_32] : memref<8x32xf32, #tpu.memory_space<vmem>>, vector<8x32xf32>
      tpu.vector_store %arg11[%c0_31, %c0_32], %42 {strides = array<i32>} : memref<8x32xf32, #tpu.memory_space<vmem>>, vector<8x32xf32>,
    } else {
    }
    %c0 = arith.constant 0 : index
    %c0_1 = arith.constant 0 : index
    %c0_2 = arith.constant 0 : index
    %3 = vector.load %arg3[%c0, %c0_1, %c0_2] : memref<1x8x32xbf16, #tpu.memory_space<vmem>>, vector<1x8x32xbf16>
    %4 = vector.shape_cast %3 : vector<1x8x32xbf16> to vector<8x32xbf16>
    %c0_3 = arith.constant 0 : index
    %c0_4 = arith.constant 0 : index
    %c0_5 = arith.constant 0 : index
    %5 = vector.load %arg4[%c0_3, %c0_4, %c0_5] : memref<1x8x32xbf16, #tpu.memory_space<vmem>>, vector<1x8x32xbf16>
    %6 = vector.shape_cast %5 : vector<1x8x32xbf16> to vector<8x32xbf16>
    %c0_6 = arith.constant 0 : index
    %c0_7 = arith.constant 0 : index
    %c0_8 = arith.constant 0 : index
    %7 = vector.load %arg5[%c0_6, %c0_7, %c0_8] : memref<1x32x16xbf16, #tpu.memory_space<vmem>>, vector<1x32x16xbf16>
    %8 = vector.shape_cast %7 : vector<1x32x16xbf16> to vector<32x16xbf16>
    %c0_9 = arith.constant 0 : index
    %c0_10 = arith.constant 0 : index
    %c0_11 = arith.constant 0 : index
    %9 = vector.load %arg6[%c0_9, %c0_10, %c0_11] : memref<1x32x16xbf16, #tpu.memory_space<vmem>>, vector<1x32x16xbf16>
    %10 = vector.shape_cast %9 : vector<1x32x16xbf16> to vector<32x16xbf16>
    %c0_12 = arith.constant 0 : index
    %c0_13 = arith.constant 0 : index
    %c0_14 = arith.constant 0 : index
    %11 = vector.load %arg7[%c0_12, %c0_13, %c0_14] : memref<1x32x16xbf16, #tpu.memory_space<vmem>>, vector<1x32x16xbf16>
    %12 = vector.shape_cast %11 : vector<1x32x16xbf16> to vector<32x16xbf16>
    %c0_15 = arith.constant 0 : index
    %c0_16 = arith.constant 0 : index
    %c0_17 = arith.constant 0 : index
    %13 = vector.load %arg8[%c0_15, %c0_16, %c0_17] : memref<1x16x32xbf16, #tpu.memory_space<vmem>>, vector<1x16x32xbf16>
    %14 = vector.shape_cast %13 : vector<1x16x32xbf16> to vector<16x32xbf16>
    %cst = arith.constant dense<0.000000e+00> : vector<8x16xf32>
    %15 = tpu.matmul %4, %8, %cst {dimension_numbers = #tpu.dot_dimension_numbers<[1], [0], [0], [1], [0, 0, 1, 1], [], []>} : vector<8x32xbf16>, vector<32x16xbf16>, vector<8x16xf32> -> vector<8x16xf32>
    %16 = arith.truncf %15 : vector<8x16xf32> to vector<8x16xbf16>
    %cst_18 = arith.constant dense<0.000000e+00> : vector<8x16xf32>
    %17 = tpu.matmul %6, %10, %cst_18 {dimension_numbers = #tpu.dot_dimension_numbers<[1], [0], [0], [1], [0, 0, 1, 1], [], []>} : vector<8x32xbf16>, vector<32x16xbf16>, vector<8x16xf32> -> vector<8x16xf32>
    %18 = arith.truncf %17 : vector<8x16xf32> to vector<8x16xbf16>
    %cst_19 = arith.constant dense<0.000000e+00> : vector<8x16xf32>
    %19 = tpu.matmul %6, %12, %cst_19 {dimension_numbers = #tpu.dot_dimension_numbers<[1], [0], [0], [1], [0, 0, 1, 1], [], []>} : vector<8x32xbf16>, vector<32x16xbf16>, vector<8x16xf32> -> vector<8x16xf32>
    %20 = arith.truncf %19 : vector<8x16xf32> to vector<8x16xbf16>
    %cst_20 = arith.constant dense<0.000000e+00> : vector<8x8xf32>
    %21 = tpu.matmul %16, %18, %cst_20 {dimension_numbers = #tpu.dot_dimension_numbers<[1], [1], [0], [0], [0, 0, 1, 0], [], []>} : vector<8x16xbf16>, vector<8x16xbf16>, vector<8x8xf32> -> vector<8x8xf32>
    %cst_21 = arith.constant dense<0xFF800000> : vector<8xf32>
    %22 = vector.multi_reduction <maximumf>, %21, %cst_21 [1] : vector<8x8xf32> to vector<8xf32>
    %23 = vector.shape_cast %22 : vector<8xf32> to vector<8x1xf32>
    %24 = vector.broadcast %23 : vector<8x1xf32> to vector<8x8xf32>
    %25 = arith.subf %21, %24 : vector<8x8xf32>
    %26 = math.exp %25 : vector<8x8xf32>
    %cst_22 = arith.constant dense<0.000000e+00> : vector<8xf32>
    %27 = vector.multi_reduction <add>, %26, %cst_22 [1] : vector<8x8xf32> to vector<8xf32>
    %28 = vector.shape_cast %27 : vector<8xf32> to vector<8x1xf32>
    %29 = tpu.reciprocal %28 {approx = true} : vector<8x1xf32> -> vector<8x1xf32>
    %30 = vector.broadcast %29 : vector<8x1xf32> to vector<8x8xf32>
    %31 = arith.mulf %26, %30 : vector<8x8xf32>
    %32 = arith.truncf %31 : vector<8x8xf32> to vector<8x8xbf16>
    %cst_23 = arith.constant dense<0.000000e+00> : vector<8x16xf32>
    %33 = tpu.matmul %32, %20, %cst_23 {dimension_numbers = #tpu.dot_dimension_numbers<[1], [0], [0], [1], [0, 0, 1, 1], [], []>} : vector<8x8xbf16>, vector<8x16xbf16>, vector<8x16xf32> -> vector<8x16xf32>
    %c0_24 = arith.constant 0 : index
    %c0_25 = arith.constant 0 : index
    %34 = vector.load %arg11[%c0_24, %c0_25] : memref<8x32xf32, #tpu.memory_space<vmem>>, vector<8x32xf32>
    %35 = arith.truncf %33 : vector<8x16xf32> to vector<8x16xbf16>
    %cst_26 = arith.constant dense<0.000000e+00> : vector<8x32xf32>
    %36 = tpu.matmul %35, %14, %cst_26 {dimension_numbers = #tpu.dot_dimension_numbers<[1], [0], [0], [1], [0, 0, 1, 1], [], []>} : vector<8x16xbf16>, vector<16x32xbf16>, vector<8x32xf32> -> vector<8x32xf32>
    %37 = arith.addf %34, %36 : vector<8x32xf32>
    %c0_27 = arith.constant 0 : index
    %c0_28 = arith.constant 0 : index
    %38 = vector.load %arg11[%c0_27, %c0_28] : memref<8x32xf32, #tpu.memory_space<vmem>>, vector<8x32xf32>
    tpu.vector_store %arg11[%c0_27, %c0_28], %37 {strides = array<i32>} : memref<8x32xf32, #tpu.memory_space<vmem>>, vector<8x32xf32>,
    %c3_i32 = arith.constant 3 : i32
    %39 = arith.cmpi eq, %arg2, %c3_i32 : i32
    %40 = arith.extui %39 : i1 to i32
    %c0_i32_29 = arith.constant 0 : i32
    %41 = arith.cmpi ne, %40, %c0_i32_29 : i32
    scf.if %41 {
      %c0_30 = arith.constant 0 : index
      %c0_31 = arith.constant 0 : index
      %42 = vector.load %arg11[%c0_30, %c0_31] : memref<8x32xf32, #tpu.memory_space<vmem>>, vector<8x32xf32>
      %c0_32 = arith.constant 0 : index
      %c0_33 = arith.constant 0 : index
      %43 = vector.load %arg9[%c0_32, %c0_33] : memref<1x32xf32, #tpu.memory_space<vmem>>, vector<1x32xf32>
      %44 = vector.broadcast %43 : vector<1x32xf32> to vector<8x32xf32>
      %45 = arith.addf %42, %44 : vector<8x32xf32>
      %c0_34 = arith.constant 0 : index
      %c0_35 = arith.constant 0 : index
      %c0_36 = arith.constant 0 : index
      %46 = vector.load %arg10[%c0_34, %c0_35, %c0_36] : memref<1x8x32xf32, #tpu.memory_space<vmem>>, vector<1x8x32xf32>
      %47 = vector.shape_cast %46 : vector<1x8x32xf32> to vector<8x32xf32>
      %48 = vector.shape_cast %45 : vector<8x32xf32> to vector<1x8x32xf32>
      tpu.vector_store %arg10[%c0_34, %c0_35, %c0_36], %48 {strides = array<i32>} : memref<1x8x32xf32, #tpu.memory_space<vmem>>, vector<1x8x32xf32>,
    } else {
    }
    return
  }
  func.func @transform_0(%arg0: i32, %arg1: i32, %arg2: i32) -> (i32, i32, i32) {
    %c0_i32 = arith.constant 0 : i32
    %c0_i32_0 = arith.constant 0 : i32
    return %arg0, %arg1, %c0_i32 : i32, i32, i32
  }
  func.func @transform_1(%arg0: i32, %arg1: i32, %arg2: i32) -> (i32, i32, i32) {
    %c0_i32 = arith.constant 0 : i32
    %c0_i32_0 = arith.constant 0 : i32
    %c0_i32_1 = arith.constant 0 : i32
    return %arg0, %c0_i32, %c0_i32_0 : i32, i32, i32
  }
  func.func @transform_2(%arg0: i32, %arg1: i32, %arg2: i32) -> (i32, i32, i32) {
    %c0_i32 = arith.constant 0 : i32
    %c0_i32_0 = arith.constant 0 : i32
    %c0_i32_1 = arith.constant 0 : i32
    return %arg2, %c0_i32, %c0_i32_0 : i32, i32, i32
  }
  func.func @transform_3(%arg0: i32, %arg1: i32, %arg2: i32) -> (i32, i32, i32) {
    %c0_i32 = arith.constant 0 : i32
    %c0_i32_0 = arith.constant 0 : i32
    %c0_i32_1 = arith.constant 0 : i32
    return %arg2, %c0_i32, %c0_i32_0 : i32, i32, i32
  }
  func.func @transform_4(%arg0: i32, %arg1: i32, %arg2: i32) -> (i32, i32, i32) {
    %c0_i32 = arith.constant 0 : i32
    %c0_i32_0 = arith.constant 0 : i32
    %c0_i32_1 = arith.constant 0 : i32
    return %arg2, %c0_i32, %c0_i32_0 : i32, i32, i32
  }
  func.func @transform_5(%arg0: i32, %arg1: i32, %arg2: i32) -> (i32, i32, i32) {
    %c0_i32 = arith.constant 0 : i32
    %c0_i32_0 = arith.constant 0 : i32
    %c0_i32_1 = arith.constant 0 : i32
    return %arg2, %c0_i32, %c0_i32_0 : i32, i32, i32
  }
  func.func @transform_6(%arg0: i32, %arg1: i32, %arg2: i32) -> (i32, i32) {
    %c0_i32 = arith.constant 0 : i32
    %c0_i32_0 = arith.constant 0 : i32
    %c0_i32_1 = arith.constant 0 : i32
    return %c0_i32, %c0_i32_0 : i32, i32
  }
  func.func @transform_7(%arg0: i32, %arg1: i32, %arg2: i32) -> (i32, i32, i32) {
    %c0_i32 = arith.constant 0 : i32
    %c0_i32_0 = arith.constant 0 : i32
    return %arg0, %arg1, %c0_i32 : i32, i32, i32
  }
}

</mosaic_0001>

<bundles_post_ra>
// kernel: tpu_custom_call.1
= control target key start
LH: loop header
LB: loop body
LE: loop exit
PB: predicated region body
PF: predicated region fallthrough
CT: control target
= control target key end

     0   :  { %s1417_s0 = inlined_call_operand.vmem [shape: bf16[2,8,32], index: 0, kind: input, shape index: {}]   ;;  %s1418_s1 = inlined_call_operand.vmem [shape: bf16[2,8,32], index: 1, kind: input, shape index: {}]   ;;  %s1419_s2 = inlined_call_operand.vmem [shape: bf16[4,32,16], index: 2, kind: input, shape index: {}]   ;;  %s1420_s3 = inlined_call_operand.vmem [shape: bf16[4,32,16], index: 3, kind: input, shape index: {}]   ;;  %s1421_s4 = inlined_call_operand.vmem [shape: bf16[4,32,16], index: 4, kind: input, shape index: {}]   ;;  %s1422_s5 = inlined_call_operand.vmem [shape: bf16[4,16,32], index: 5, kind: input, shape index: {}]   ;;  %s1423_s6 = inlined_call_operand.vmem [shape: f32[1,32], index: 6, kind: input, shape index: {}]   ;;  %s1424_s7 = inlined_call_operand.hbm [shape: f32[2,8,32], index: 7, kind: output, shape index: {}]  }
   0x1   :  { %1434 = sst [smem:[#allocation15_spill]] %s1417_s0 }
   0x2   :  { %12 = vsyncpa [#allocation4], 0 }
   0x3   :  { %14 = vsyncpa [#allocation4 + $0x1], 0  ;;  %s1238_s24 = smov 0   ;;  %s1240_s25 = smov 0  }
   0x4   :  { %s1242_s26 = smov 0   ;;  %s1244_s27 = smov 0  }
   0x5   :  { %s1246_s28 = smov 0   ;;  %s1248_s29 = smov 0  }
   0x6   :  { %s1250_s30 = smov 0   ;;  %s1252_s8 = smov 0  }
   0x7 LB: > { %1435 = sst [smem:[#allocation6_spill]] %s1164_s24  ;;  %s918_s9 = sadd.s32 4294967295, %s1192_s8   ;;  %s1192_s8 = sphi %s1252_s8, %s20_s8   ;;  %s1188_s30 = sphi %s1250_s30, %s1456_s30   ;;  %s1184_s29 = sphi %s1248_s29, %s1460_s29   ;;  %s1180_s28 = sphi %s1246_s28, %s1454_s28   ;;  %s1176_s27 = sphi %s1244_s27, %s1453_s27   ;;  %s1172_s26 = sphi %s1242_s26, %s1459_s26   ;;  %s1168_s25 = sphi %s1240_s25, %s1458_s25   ;;  %s1164_s24 = sphi %s1238_s24, %s1457_s24  }
   0x8   : > { %1436 = sst [smem:[#allocation7_spill]] %s1172_s26  ;;  %s919_s10 = sadd.s32 4294967294, %s1192_s8  }
   0x9   : > { %1437 = sst [smem:[#allocation8_spill]] %s1184_s29  ;;  %s32_s11 = sadd.s32 1, %s1184_s29 }
   0xa   : > { %1438 = sst [smem:[#allocation9_spill]] %s1188_s30  ;;  %p33_p0 = scmp.ge.s32.totalorder %s32_s11, 4 }
   0xb   : > { %1439 = sst [smem:[#allocation10_spill]] %s1192_s8  ;;  %s39_s12 = sadd.s32 1, %s1188_s30 }
   0xc   : > { %p237_p1 = scmp.ne.s32.totalorder %s1172_s26, %s1168_s25  ;;  %p238_p2 = scmp.eq.s32.totalorder %s918_s9, 7 }
   0xd   : > { %s1462_s11 = smov (%p33_p0, %s32_s11), 0  ;;  %s1464_s12 = smov (!%p33_p0, %s39_s12), %s1188_s30 }
   0xe   : > { %1440 = sst [smem:[#allocation11_spill]] %s1462_s11  ;;  %p1287_p3 = por %p238_p2, %p237_p1 }
   0xf   : > { %p243_p4 = scmp.ne.s32.totalorder %s1168_s25, %s1164_s24  ;;  %p41_p5 = scmp.ge.s32.totalorder %s1464_s12, 2 }
  0x10   : > { %p244_p6 = scmp.eq.s32.totalorder %s919_s10, 7  ;;  %p922_p7 = scmp.ge.s32.totalorder %s1192_s8, 1 }
  0x11   : > { %p314_p8 = scmp.lt.s32.totalorder %s1192_s8, 9  ;;  %s1466_s12 = smov (%p41_p5, %s1464_s12), 0 }
  0x12   : > { %1442 = sst [smem:[#allocation12_spill]] %s1466_s12  ;;  %p1297_p9 = por %p244_p6, %p243_p4 }
  0x13   : > { %p315_p10 = pnand %p922_p7, %p314_p8  ;;  %s222_s15 = ssub.s32 %s1188_s30, %s1466_s12 }
  0x14   : > { %s1443_s14 = scalar_select %p1297_p9, 1, 0 }
  0x15   : > { %s227_s16 = sadd.s32 1, %s1172_s26  ;;  %p225_p11 = scmp.eq.s32.totalorder %s222_s15, 0 }
  0x16   : > { %1444 = sst [smem:[#allocation13_spill]] %s1443_s14  ;;  %318 = sbr.rel (%p315_p10) target bundleno = 1185 (0x4a1), region = 48 }
  0x17   : > { %s1305_s17 = scalar_select %p225_p11, %s1172_s26, %s227_s16  }
  0x18   : > { %s1428_s18 = sand.u32 (!%p315_p10), 1, %s1168_s25   ;;  %p372_p12 = scmp.lt.s32.totalorder (!%p315_p10), %s1180_s28, 1 }
  0x19   : > { %1445 = sst [smem:[#allocation14_spill]] %s1305_s17  ;;  %s1311_s19 = sshll.u32 (!%p315_p10), %s1428_s18, 3 }
  0x1a   : > { %p383_p13 = scmp.lt.s32.totalorder (!%p315_p10), %s1176_s27, 3  ;;  %s1446_s0 = sld [smem:[#allocation15_spill]] (!%p315_p10) }
  0x1b   : > { %s373_s20 = scalar_select %p372_p12, %s1180_s28, 1 }
  0x1c   : > { %s384_s21 = scalar_select %p383_p13, %s1176_s27, 3 }
  0x1d   : > { %s924_s22 = sshll.u32 %s373_s20, 2  ;;  %p934_p0 = scmp.ne.s32.totalorder %s1176_s27, 0 }
  0x1e   : > { %s382_s12 = scalar_lea.vmem %s1418_s1, %s924_s22  ;;  %s954_s11 = sshll.u32 %s384_s21, 4 }
  0x1f   : > { %s957_s30 = sshll.u32 %s384_s21, 3  ;;  %s387_s18 = scalar_lea.vmem %s1419_s2, %s954_s11 }
  0x20   : > { %s1319_s10 = scalar_lea.vmem %s1446_s0, %s924_s22  ;;  %s392_s24 = scalar_lea.vmem %s1420_s3, %s954_s11 }
  0x21   : > { %s1333_s23 = scalar_lea.vmem %s1421_s4, %s954_s11  ;;  %s1338_s15 = scalar_lea.vmem %s1422_s5, %s957_s30 }
  0x22   : > { %s371_s22 = scalar_lea.vmem [#allocation3], %s1311_s19  ;;  %407 = sbr.rel (%p934_p0) target bundleno = 41 (0x29), region = 52 }
  0x27   : > { %vm408_vm0 = vcmask 261120   ;;  %v1194_v0 = vmov 0.0  }
  0x28   : > { %409 = vst.msk [vmem:[#allocation2] sm:$0xff] %vm408_vm0, %v1194_v0 }
  0x29 PF: > { %v1089_v1 = vld [vmem:[%s392_s24 + $0x8] sm:$0xff]   ;;  %v1195_v2 = vmov 0.0   ;;  %v1091_v4 = vld [vmem:[%s392_s24] sm:$0xff]   ;;  %vm1196_vm1 = vmmov 0   ;;  %vm438_vm2 = vcmask 261120   ;;  %vm592_vm3 = vcmask 130048  }
  0x2a   : > { %981 = vmatprep.subr.bf16.mxu1 %v1195_v2  ;;  %973 = vmatprep.subr.bf16.mxu0 %v1195_v2  ;;  %v1090_v3 = vld [vmem:[%s387_s18 + $0x8] sm:$0xff]   ;;  %v1092_v5 = vld [vmem:[%s387_s18] sm:$0xff]   ;;  %vm639_vm4 = vcmask 64512   ;;  %vm655_vm5 = vcmask 1043456   ;;  %p948_p1 = scmp.ne.s32.totalorder %s1176_s27, 3 }
  0x2b   : > { %982 = vmatpush3.bf16.msra.mxu1 %v1089_v1  ;;  %985 = vmatprep.mubr.msk.bf16.mxu1 %vm1196_vm1, %v1195_v2  ;;  %v411_v6 = vld [vmem:[%s382_s12] sm:$0xf]  ;;  %v1093_v19 = vld [vmem:[%s1333_s23 + $0x8] sm:$0xff]  }
  0x2c   : > { %974 = vmatpush3.bf16.msra.mxu0 %v1090_v3  ;;  %983 = vmatprep.subr.bf16.mxu1 %v1195_v2  ;;  %v410_v7 = vld [vmem:[%s1319_s10] sm:$0xf] }
  0x2d   : > { %975 = vmatprep.subr.bf16.mxu0 %v1195_v2  ;;  %977 = vmatprep.mubr.msk.bf16.mxu0 %vm1196_vm1, %v1195_v2  ;;  %v1094_v20 = vld [vmem:[%s1333_s23] sm:$0xff]  }
  0x2e   : > { %v1095_v37 = vld [vmem:[%s1338_s15] sm:$0xff]  }
  0x2f   : > { %984 = vmatpush3.bf16.msra.mxu1 %v1091_v4  ;;  %v699_v47 = vld [vmem:[#allocation2] sm:$0xff] }
  0x30   : > { %976 = vmatpush3.bf16.msra.mxu0 %v1092_v5  ;;  %997 = vmatprep.subr.bf16.mxu1 %v1195_v2 }
  0x31   : > { %989 = vmatprep.subr.bf16.mxu0 %v1195_v2 }
  0x32   : > { %986 = vmatmul.mubr.msk.bf16.vlgmr.msra.gmra.mxu1 %vm438_vm2, %v411_v6 }
  0x33   : > { %978 = vmatmul.mubr.msk.bf16.vlgmr.msra.gmra.mxu0 %vm438_vm2, %v410_v7  ;;  %999 = vmatprep.mubr.msk.bf16.mxu1 %vm1196_vm1, %v1195_v2 }
  0x34   : > { %993 = vmatprep.mubr.msk.bf16.mxu0 %vm1196_vm1, %v1195_v2  ;;  %990 = vmatpush3.bf16.msra.mxu0 %v1093_v19 }
  0x35   : > { %991 = vmatprep.subr.bf16.mxu0 %v1195_v2 }
  0x38   : > { %992 = vmatpush3.bf16.msra.mxu0 %v1094_v20 }
  0x39   : > { %1003 = vmatprep.subr.bf16.mxu0 %v1195_v2 }
  0x3b   : > { %994 = vmatmul.mubr.msk.bf16.vlgmr.msra.gmra.mxu0 %vm438_vm2, %v411_v6 }
  0x3c   : > { %1005 = vmatprep.mubr.msk.bf16.mxu0 %vm1196_vm1, %v1195_v2 }
  0xf2   : > { %v532_v8 = vpop.f32.mrf.mxu1 }
  0xf3   : > { %v538_v9 = vpack.c.bf16 %v532_v8, %v532_v8  ;;  %v476_v10 = vpop.f32.mrf.mxu0 }
  0xf4   : > { %v987_v11 = vpop.f32.mrf.mxu1  ;;  %v482_v17 = vpack.c.bf16 %v476_v10, %v476_v10 }
  0xf5   : > { %v597_v12 = vsel %vm592_vm3, %v538_v9, 0  ;;  %v979_v13 = vpop.f32.mrf.mxu0 }
  0xf6   : > { %v535_v14 = vpop.f32.mrf.mxu1  ;;  %998 = vmatpush3.bf16.xpose.msra.mxu1 %v597_v12 }
  0xf7   : > { %v479_v15 = vpop.f32.mrf.mxu0  ;;  %1009 = vmatprep.subr.bf16.mxu1 %v1195_v2 }
  0xf8   : > { %v988_v16 = vpop.f32.mrf.mxu1 }
  0xf9   : > { %v980_v18 = vpop.f32.mrf.mxu0 }
  0xfb   : > { %v585_v31 = vpop.f32.mrf.mxu0 }
  0xfc   : > { %v591_v32 = vpack.c.bf16 %v585_v31, %v585_v31 }
  0xfd   : > { %1000 = vmatmul.mubr.msk.bf16.vlgmr.msra.gmra.mxu1 %vm592_vm3, %v482_v17  ;;  %v995_v33 = vpop.f32.mrf.mxu0 }
  0xfe   : > { %1011 = vmatprep.mubr.msk.bf16.mxu1 %vm1196_vm1, %v1195_v2  ;;  %v657_v34 = vsel %vm655_vm5, %v591_v32, 0  ;;  %1010 = vmatpush3.bf16.msra.mxu1 %v1095_v37 }
  0xff   : > { %v588_v35 = vpop.f32.mrf.mxu0  ;;  %1004 = vmatpush3.bf16.msra.mxu0 %v657_v34 }
 0x101   : > { %v996_v36 = vpop.f32.mrf.mxu0 }
 0x1bd   : > { %v633_v21 = vpop.f32.mrf.mxu1 }
 0x1be   : > { %v640_v22 = vsel %vm639_vm4, %v633_v21, -inf }
 0x1bf   : > { %641 = vmax.xlane.f32.xlu0 %v640_v22  ;;  %v1001_v23 = vpop.f32.mrf.mxu1 }
 0x1c1   : > { %v636_v24 = vpop.f32.mrf.mxu1 }
 0x1c3   : > { %v1002_v25 = vpop.f32.mrf.mxu1 }
 0x248   : > { %v642_v26 = vpop.xlane.xlu0 %641 }
 0x249   : > { %v643_v27 = vsub.f32 %v633_v21, %v642_v26 }
 0x24b   : > { %v644_v28 = vmul.f32 1.442695, %v643_v27 }
 0x24d   : > { %1096 = vpow2.f32 %v644_v28 }
 0x25a   : > { %v1097_v29 = vpop.eup %1096 }
 0x25b   : > { %v646_v30 = vsel %vm639_vm4, %v1097_v29, 0.0 }
 0x25c   : > { %647 = vadd.xlane.f32.xlu0 %v646_v30 }
 0x2e5   : > { %v648_v38 = vpop.xlane.xlu0 %647 }
 0x2e6   : > { %1098 = vrcp.f32 %v648_v38 }
 0x2f3   : > { %v1099_v39 = vpop.eup %1098 }
 0x2f4   : > { %v650_v40 = vmul.f32 %v1099_v39, %v1097_v29 }
 0x2f6   : > { %v651_v41 = vpack.c.bf16 %v650_v40, %v650_v40 }
 0x2f8   : > { %1006 = vmatmul.mubr.msk.bf16.vlgmr.msra.gmra.mxu0 %vm639_vm4, %v651_v41 }
 0x3b8   : > { %v693_v42 = vpop.f32.mrf.mxu0 }
 0x3b9   : > { %v700_v43 = vpack.c.bf16 %v693_v42, %v693_v42 }
 0x3ba   : > { %v1007_v44 = vpop.f32.mrf.mxu0 }
 0x3bb   : > { %1012 = vmatmul.mubr.msk.bf16.vlgmr.msra.gmra.mxu1 %vm592_vm3, %v700_v43 }
 0x3bc   : > { %v696_v45 = vpop.f32.mrf.mxu0 }
 0x3be   : > { %v1008_v46 = vpop.f32.mrf.mxu0 }
 0x47b   : > { %v744_v48 = vpop.f32.mrf.mxu1 }
 0x47c   : > { %v750_v49 = vadd.f32 %v744_v48, %v699_v47 }
 0x47d   : > { %v1013_v50 = vpop.f32.mrf.mxu1  ;;  %755 = sbr.rel (%p948_p1) target bundleno = 1161 (0x489), region = 56 }
 0x47e   : > { %751 = vst.msk [vmem:[#allocation2] sm:$0xff] %vm438_vm2, %v750_v49 }
 0x47f   : > { %v747_v51 = vpop.f32.mrf.mxu1 }
 0x481   : > { %v1014_v52 = vpop.f32.mrf.mxu1 }
 0x482   : > { %v949_v54 = vld [vmem:[%s1423_s6] ss:$0 sm:$0xff] }
 0x485   : > { %v756_v53 = vld [vmem:[#allocation2] sm:$0xff] }
 0x486   : > { %v764_v55 = vadd.f32 %v949_v54, %v756_v53 }
 0x488   : > { %765 = vst.msk [vmem:[%s371_s22] sm:$0xff] %vm438_vm2, %v764_v55 }
 0x489 PF: > { %s951_s26 = sshll.u32 %s1180_s28, 7  ;;  %s781_s8 = sshll.u32 %s371_s22, 4  ;;  %s782_s8 = int_to_ptr.vmem [resolvable:$true] %s781_s8 }
 0x48a   : > { %s779_s27 = scalar_lea.hbm %s1424_s7, %s951_s26  ;;  %s1447_s11 = sand.u32 1, %s1168_s25  }
 0x48b   : > { %s767_s12 = scalar_lea.sflag [#allocation4], %s1447_s11  ;;  %s1100_s14 = scalar_lea.vmem %s782_s8, 128 }
 0x48c   : > { %p1101_p2 = scmp.ne.s32.totalorder %s782_s8, %s1100_s14  ;;  %s1197_s17 = smov [#allocation3]  }
 0x48d   : > { %s1104_s18 = sshll.u32 %s1197_s17, 4  ;;  %s1105_s18 = int_to_ptr.vmem [resolvable:$false] %s1104_s18 }
 0x48e   : > { %p1102_p4 = pnand %p1101_p2, %p1287_p3  ;;  %s1106_s21 = scalar_lea.vmem %s1105_s18, 256 }
 0x48f   : > { %p1107_p6 = scmp.lt.s32.totalorder %s782_s8, %s1105_s18  ;;  %p1108_p7 = scmp.lt.s32.totalorder %s1106_s21, %s1100_s14 }
 0x490   : > { %p1103_p5 = pneg %p1102_p4 }
 0x491   : > { %p1109_p8 = por %p1108_p7, %p1107_p6 }
 0x493   : > { %p1110_p10 = pnand %p1109_p8, %p1103_p5 }
 0x495   : > { %1113 = shalt.err (!%p1110_p10)
}
 0x496   : > { %s1114_s28 = scalar_lea.hbm %s779_s27, 128  ;;  %s1118_s16 = scalar_lea.hbm %s1424_s7, 256 }
 0x497   : > { %p1115_p11 = scmp.ne.s32.totalorder %s779_s27, %s1114_s28  ;;  %p1119_p0 = scmp.lt.s32.totalorder %s779_s27, %s1424_s7 }
 0x498   : > { %p1120_p1 = scmp.lt.s32.totalorder %s1118_s16, %s1114_s28 }
 0x499   : > { %p1116_p12 = pnand %p1115_p11, %p1287_p3 }
 0x49a   : > { %p1121_p2 = por %p1120_p1, %p1119_p0 }
 0x49b   : > { %p1117_p13 = pneg %p1116_p12 }
 0x49d   : > { %p1122_p4 = pnand %p1121_p2, %p1117_p13 }
 0x49f   : > { %1125 = shalt.err (!%p1122_p4)
}
 0x4a0   : > { %1015 = dma.vmem_to_hbm [thread:$0]  (%p1287_p3), %s782_s8, 128, %s779_s27, %s767_s12  }
 0x4a1 PF: > { %s1448_s9 = sld [smem:[#allocation10_spill]] }
 0x4a2   : > { %s1449_s15 = sld [smem:[#allocation6_spill]] }
 0x4a7   : > { %p1021_p5 = scmp.ge.s32.totalorder %s1448_s9, 2 }
 0x4a8   : > { %s793_s0 = sand.u32 1, %s1449_s15  }
 0x4a9   : > { %p1018_p6 = pnand %p1021_p5, %p1297_p9  ;;  %s794_s24 = scalar_lea.sflag [#allocation4], %s793_s0 }
 0x4ab   : > { %p1019_p7 = pneg %p1018_p6 }
 0x4ad   : > { %1159 = dma.done.wait (%p1019_p7), %s794_s24, 128  }
 0x4ae   : > { %1161 = vsyncadd (%p1019_p7), %s794_s24, 4294967168  ;;  %s20_s8 = sadd.s32 1, %s1448_s9   ;;  %s1451_s26 = sld [smem:[#allocation7_spill]] }
 0x4af   : > { %p17_p8 = scmp.ge.s32.totalorder %s20_s8, 10   ;;  %s1452_s29 = sld [smem:[#allocation14_spill]] }
 0x4b0   : > { %s1453_s27 = sld [smem:[#allocation8_spill]]  ;;  %s1457_s24 = smov %s1168_s25 }
 0x4b1   : > { %s1454_s28 = sld [smem:[#allocation9_spill]] }
 0x4b2   : > { %s1455_s13 = sld [smem:[#allocation11_spill]] }
 0x4b3   : > { %s1456_s30 = sld [smem:[#allocation12_spill]] }
 0x4b4   : > { %s1458_s25 = smov %s1451_s26  ;;  %19 = sbr.rel (!%p17_p8) target bundleno = 7 (0x7), region = 106 }
 0x4b5   : > { %s1459_s26 = smov %s1452_s29 }
 0x4b8   : > { %s1460_s29 = smov %s1455_s13 }
 0x4b9   :  { %799 = vsyncpa [#allocation4], 1 }
 0x4ba   :  { %801 = vsyncpa [#allocation4 + $0x1], 1 }

</bundles_post_ra>
